<compile_context>
chip_gen: v6e
topology: v6e:2x2x1
jax: 0.10.0
libtpu: 0.0.40
codegen_flags: <defaults>
</compile_context>

<pallas_src>
import jax
import jax.numpy as jnp
from jax.experimental import pallas as pl
from jax.experimental.pallas import tpu as pltpu


def _round_up(v: int, m: int) -> int:
    return ((v + m - 1) // m) * m


def _make_gine_kernel(inference_mode: str, mp_threshold: float, eps: float,
                      mxu_dtype):
    """Builds the fused, edge-tiled GINE-layer kernel body (static config)."""
    cos_eps2 = 1e-16          # (torch cosine_similarity eps = 1e-8) squared
    average = inference_mode == 'average'

    def kernel(*refs):
        if average:
            (x_ref, ea_ref, srcc_ref, dstc_ref, dstr_ref,
             w1_ref, b1_ref, w2_ref, b2_ref, o_ref, acc_ref) = refs
        else:
            (x_ref, ea_ref, srcc_ref, dstr_ref,
             w1_ref, b1_ref, w2_ref, b2_ref, o_ref, acc_ref) = refs

        e = pl.program_id(0)

        # ---- init (first edge tile): zero the scatter accumulator -----------
        @pl.when(e == 0)
        def _init():
            acc_ref[...] = jnp.zeros_like(acc_ref)

        n_pad = x_ref.shape[0]        # padded node count

        # ---- one-hot gather/scatter tiles, built on-chip ---------------------
        # Tiny (1,N)/(N,1) iotas + broadcast compares (no full-shape iota is
        # rebuilt per tile and no O(N*TE) iota scratch is needed).
        #   src_oh   : (TE, N)  row e has a 1 in column src[e]  -> gather matmul
        #   dst_oh_t : (N, TE)  column e has a 1 in row dst[e]  -> scatter matmul
        node_lane = jax.lax.broadcasted_iota(jnp.int32, (1, n_pad), 1)   # (1, N)
        node_sub = jax.lax.broadcasted_iota(jnp.int32, (n_pad, 1), 0)    # (N, 1)
        src_oh = (node_lane == srcc_ref[...]).astype(mxu_dtype)          # (TE, N)
        dst_oh_t = (node_sub == dstr_ref[...]).astype(mxu_dtype)         # (N, TE)

        x_mx = x_ref[...].astype(mxu_dtype)                              # (N, D)

        # ---- gather source features (MXU) ------------------------------------
        x_src = jnp.dot(src_oh, x_mx,
                        preferred_element_type=jnp.float32)              # (TE, D)

        # GINE message: ReLU(x_src + edge_attr)
        msg = jnp.maximum(x_src + ea_ref[...].astype(jnp.float32), 0.0)

        if average:
            # Cosine similarity straight from the gathered tiles: only one
            # extra (TE,N)@(N,D) matmul and no node-level scratch.
            dst_oh = (node_lane == dstc_ref[...]).astype(mxu_dtype)      # (TE, N)
            x_dst = jnp.dot(dst_oh, x_mx,
                            preferred_element_type=jnp.float32)          # (TE, D)
            dotp = jnp.sum(x_src * x_dst, axis=-1, keepdims=True)
            ss_s = jnp.sum(x_src * x_src, axis=-1, keepdims=True)
            ss_d = jnp.sum(x_dst * x_dst, axis=-1, keepdims=True)
            sim = (dotp
                   * jax.lax.rsqrt(jnp.maximum(ss_s, cos_eps2))
                   * jax.lax.rsqrt(jnp.maximum(ss_d, cos_eps2)))
            keep = ((sim + 1.0) * 0.5 >= mp_threshold).astype(jnp.float32)
            msg = msg * keep
        # 'original': all-ones mask -> skip sim / mask work entirely.

        # ---- scatter-add into destination nodes (natural matmul, no .T) ------
        acc_ref[...] += jnp.dot(dst_oh_t, msg.astype(mxu_dtype),
                                preferred_element_type=jnp.float32)      # (N, D)

        # ---- finalize (last edge tile): GINE update + MLP ---------------------
        @pl.when(e == pl.num_programs(0) - 1)
        def _finalize():
            h = (1.0 + eps) * x_ref[...].astype(jnp.float32) + acc_ref[...]
            h1 = jnp.dot(h.astype(mxu_dtype), w1_ref[...].astype(mxu_dtype),
                         preferred_element_type=jnp.float32)
            h1 = jnp.maximum(h1 + b1_ref[...].astype(jnp.float32), 0.0)
            out = jnp.dot(h1.astype(mxu_dtype), w2_ref[...].astype(mxu_dtype),
                          preferred_element_type=jnp.float32)
            out = out + b2_ref[...].astype(jnp.float32)
            o_ref[...] = out.astype(o_ref.dtype)

    return kernel


def _vmem_budget(n_pad, d_pad, h_pad, te, mxu_dtype, average):
    """Scoped-VMEM budget including one-hot temporaries, generation-aware cap."""
    f32 = 4
    mxu_b = jnp.dtype(mxu_dtype).itemsize
    n_id_cols = 2 if average else 1
    # node-resident blocks: x (2 bufs), out (2 bufs), f32 accumulator scratch
    node_resident = 5 * n_pad * d_pad * f32
    # MLP weights / biases (2 bufs each; biases sublane/lane padded)
    weights = 2 * f32 * (d_pad * h_pad + h_pad * d_pad + 8 * h_pad + 8 * d_pad)
    # per-tile edge blocks (2 bufs): edge_attr, id columns (lane-padded to 128),
    # id row (sublane-padded to 8)
    edge_tiles = 2 * (te * d_pad * f32 + n_id_cols * te * 128 * 4 + 8 * te * 4)
    # on-chip one-hot tiles + message / gathered-feature / MLP temporaries
    onehots = (3 if average else 2) * te * n_pad * mxu_b
    temps = 4 * te * d_pad * f32 + n_pad * (d_pad + h_pad) * f32
    est = node_resident + weights + edge_tiles + onehots + temps
    try:
        phys = pltpu.get_tpu_info().vmem_capacity_bytes
    except Exception:
        phys = 64 * 1024 * 1024        # conservative (v7x-sized) fallback
    cap = (phys * 3) // 4              # ~96 MiB on v5e/v6e, ~48 MiB on v7x
    return int(min(max(2 * est, 16 * 1024 * 1024), cap))


def _gine_layer_pallas(x_p, ea_p, src_col, dst_col, dst_row,
                       w1_p, b1_p, w2_p, b2_p, *,
                       inference_mode, mp_threshold, eps, edge_tile, mxu_dtype):
    n_pad, d_pad = x_p.shape
    e_pad = ea_p.shape[0]
    h_pad = w1_p.shape[1]
    te = edge_tile
    n_tiles = e_pad // te
    average = inference_mode == 'average'

    kernel = _make_gine_kernel(inference_mode, mp_threshold, eps, mxu_dtype)

    in_specs = [
        pl.BlockSpec((n_pad, d_pad), lambda e: (0, 0)),   # x (node-resident)
        pl.BlockSpec((te, d_pad),    lambda e: (e, 0)),   # edge_attr tile
        pl.BlockSpec((te, 1),        lambda e: (e, 0)),   # src ids (column)
    ]
    inputs = [x_p, ea_p, src_col]
    if average:
        in_specs.append(pl.BlockSpec((te, 1), lambda e: (e, 0)))   # dst ids (col)
        inputs.append(dst_col)
    in_specs += [
        pl.BlockSpec((1, te),        lambda e: (0, e)),   # dst ids (row)
        pl.BlockSpec((d_pad, h_pad), lambda e: (0, 0)),   # w1
        pl.BlockSpec((1, h_pad),     lambda e: (0, 0)),   # b1
        pl.BlockSpec((h_pad, d_pad), lambda e: (0, 0)),   # w2
        pl.BlockSpec((1, d_pad),     lambda e: (0, 0)),   # b2
    ]
    inputs += [dst_row, w1_p, b1_p, w2_p, b2_p]

    grid_spec = pltpu.PrefetchScalarGridSpec(
        num_scalar_prefetch=0,
        grid=(n_tiles,),
        in_specs=in_specs,
        out_specs=pl.BlockSpec((n_pad, d_pad), lambda e: (0, 0)),
        scratch_shapes=[pltpu.VMEM((n_pad, d_pad), jnp.float32)],   # scatter acc
    )

    vmem_limit = _vmem_budget(n_pad, d_pad, h_pad, te, mxu_dtype, average)

    return pl.pallas_call(
        kernel,
        grid_spec=grid_spec,
        out_shape=jax.ShapeDtypeStruct((n_pad, d_pad), x_p.dtype),
        compiler_params=pltpu.CompilerParams(
            dimension_semantics=("arbitrary",),   # edge axis is a reduction
            vmem_limit_bytes=vmem_limit),
    )(*inputs)


def rw_mpnn_layer(x, edge_index, edge_attr, params, *,
                  num_layer_MPNN=1, similarity_type='cos',
                  inference_mode='original', mp_threshold=0.0, eps=0.0,
                  edge_tile=None, mxu_dtype=None):
    """Forward pass of RW_MPNN_layer. params = list of (w1, b1, w2, b2)."""
    if similarity_type != 'cos':
        raise NotImplementedError(similarity_type)
    if inference_mode not in ('original', 'average'):
        raise NotImplementedError(inference_mode)
    if mxu_dtype is None:
        # bf16 matmuls with f32 accumulation: ~4-6x fewer MXU passes than f32
        # on every TPU generation.  Pass jnp.float32 for near-bit-exact output.
        mxu_dtype = jnp.bfloat16

    n, d = x.shape
    e = int(edge_attr.shape[0])

    # ---- padding: lanes to 128, sublanes to the MXU-dtype packing, edges to
    #      the tile size -------------------------------------------------------
    d_pad = _round_up(d, 128)
    mxu_bytes = jnp.dtype(mxu_dtype).itemsize
    sublane = {4: 8, 2: 16, 1: 32}.get(mxu_bytes, 8)
    n_pad = _round_up(n, sublane)
    if edge_tile is None:
        # keep the scatter contraction >= 256 deep (fills v6e/v7x MXU)
        edge_tile = min(512, max(256, _round_up(e, 128)))
    edge_tile = max(128, _round_up(edge_tile, 128))
    e_pad = _round_up(max(e, 1), edge_tile)

    x_p = jnp.zeros((n_pad, d_pad), x.dtype).at[:n, :d].set(x)
    ea_p = jnp.zeros((e_pad, d_pad), x.dtype).at[:e, :d].set(edge_attr)

    # padded edges point at node id n_pad (never matches any iota value) so
    # their one-hot rows/cols are all zero -> they contribute nothing.
    src = edge_index[0].astype(jnp.int32)
    dst = edge_index[1].astype(jnp.int32)
    src_p = jnp.full((e_pad,), n_pad, jnp.int32).at[:e].set(src)
    dst_p = jnp.full((e_pad,), n_pad, jnp.int32).at[:e].set(dst)
    src_col = src_p.reshape(e_pad, 1)
    dst_col = dst_p.reshape(e_pad, 1)
    dst_row = dst_p.reshape(1, e_pad)

    for l in range(num_layer_MPNN):
        w1, b1, w2, b2 = params[l]
        h = w1.shape[1]
        h_pad = _round_up(h, 128)
        w1_p = jnp.zeros((d_pad, h_pad), w1.dtype).at[:d, :h].set(w1)
        b1_p = jnp.zeros((1, h_pad), w1.dtype).at[:, :h].set(jnp.reshape(b1, (1, h)))
        w2_p = jnp.zeros((h_pad, d_pad), w2.dtype).at[:h, :d].set(w2)
        b2_p = jnp.zeros((1, d_pad), w2.dtype).at[:, :d].set(jnp.reshape(b2, (1, d)))
        x_p = _gine_layer_pallas(
            x_p, ea_p, src_col, dst_col, dst_row, w1_p, b1_p, w2_p, b2_p,
            inference_mode=inference_mode, mp_threshold=mp_threshold, eps=eps,
            edge_tile=edge_tile, mxu_dtype=mxu_dtype)

    return x_p[:n, :d]


def _reference(x, edge_index, edge_attr, params, *, num_layer_MPNN=1,
               inference_mode='original', mp_threshold=0.0, eps=0.0):
    """Pure-JAX reference matching the PyTorch forward."""
    for l in range(num_layer_MPNN):
        w1, b1, w2, b2 = params[l]
        src, dst = edge_index[0], edge_index[1]
        x_src, x_dst = x[src], x[dst]
        if inference_mode == 'average':
            n_s = jnp.maximum(jnp.linalg.norm(x_src, axis=-1), 1e-8)
            n_d = jnp.maximum(jnp.linalg.norm(x_dst, axis=-1), 1e-8)
            sim = jnp.sum(x_src * x_dst, axis=-1) / (n_s * n_d)
            keep = ((sim + 1.0) * 0.5 >= mp_threshold).astype(x.dtype)
        else:
            keep = jnp.ones((src.shape[0],), x.dtype)
        msg = jnp.maximum(x_src + edge_attr, 0.0) * keep[:, None]
        agg = jnp.zeros_like(x).at[dst].add(msg)
        h = (1.0 + eps) * x + agg
        x = jnp.maximum(h @ w1 + jnp.reshape(b1, (1, -1)), 0.0) @ w2 \
            + jnp.reshape(b2, (1, -1))
    return x


if __name__ == "__main__":
    key = jax.random.PRNGKey(0)
    N, D, E, H = 32, 32, 64, 64          # nodes, feat dim, edges, MLP hidden
    num_layer_MPNN = 1

    k = jax.random.split(key, 8)
    x = jax.random.normal(k[0], (N, D), dtype=jnp.float32)
    edge_attr = jax.random.normal(k[1], (E, D), dtype=jnp.float32)
    edge_index = jnp.stack([
        jax.random.randint(k[2], (E,), 0, N),
        jax.random.randint(k[3], (E,), 0, N),
    ], axis=0)                            # (2, E)

    def lin_init(kw, kb, fan_in, fan_out):
        bound = 1.0 / jnp.sqrt(jnp.float32(fan_in))
        w = jax.random.uniform(kw, (fan_in, fan_out), jnp.float32, -bound, bound)
        b = jax.random.uniform(kb, (1, fan_out), jnp.float32, -bound, bound)
        return w, b

    params = []
    for l in range(num_layer_MPNN):
        w1, b1 = lin_init(k[4], k[5], D, H)
        w2, b2 = lin_init(k[6], k[7], H, D)
        params.append((w1, b1, w2, b2))

    ref = _reference(x, edge_index, edge_attr, params,
                     num_layer_MPNN=num_layer_MPNN, inference_mode='original')

    # ---- default 'original' mode, bf16 MXU path (loose tolerance) ------------
    out_bf16 = rw_mpnn_layer(x, edge_index, edge_attr, params,
                             num_layer_MPNN=num_layer_MPNN,
                             inference_mode='original')
    out_bf16 = jax.block_until_ready(out_bf16)
    assert out_bf16.shape == (N, D)
    assert jnp.allclose(out_bf16, ref, rtol=5e-2, atol=5e-2), "mismatch (original, bf16)"

    # ---- 'original' mode, f32 MXU path (tight tolerance) ---------------------
    out_f32 = rw_mpnn_layer(x, edge_index, edge_attr, params,
                            num_layer_MPNN=num_layer_MPNN,
                            inference_mode='original', mxu_dtype=jnp.float32)
    out_f32 = jax.block_until_ready(out_f32)
    assert jnp.allclose(out_f32, ref, rtol=2e-3, atol=2e-3), "mismatch (original, f32)"

    # ---- cosine-gated 'average' mode (f32 MXU so threshold decisions are
    #      bit-stable vs the reference) ----------------------------------------
    out_avg = rw_mpnn_layer(x, edge_index, edge_attr, params,
                            num_layer_MPNN=num_layer_MPNN,
                            inference_mode='average', mp_threshold=0.5,
                            mxu_dtype=jnp.float32)
    out_avg = jax.block_until_ready(out_avg)
    ref_avg = _reference(x, edge_index, edge_attr, params,
                         num_layer_MPNN=num_layer_MPNN,
                         inference_mode='average', mp_threshold=0.5)
    assert jnp.allclose(out_avg, ref_avg, rtol=2e-3, atol=2e-3), "mismatch (average)"

    print("KERNEL_OK")
</pallas_src>

<mosaic_0001>
module attributes {stable_mosaic.version = 11 : i64} {
  func.func @kernel(%arg0: i32, %arg1: memref<32x128xf32, #tpu.memory_space<vmem>>, %arg2: memref<256x128xf32, #tpu.memory_space<vmem>>, %arg3: memref<256x1xi32, #tpu.memory_space<vmem>>, %arg4: memref<1x256xi32, #tpu.memory_space<vmem>>, %arg5: memref<128x128xf32, #tpu.memory_space<vmem>>, %arg6: memref<1x128xf32, #tpu.memory_space<vmem>>, %arg7: memref<128x128xf32, #tpu.memory_space<vmem>>, %arg8: memref<1x128xf32, #tpu.memory_space<vmem>>, %arg9: memref<32x128xf32, #tpu.memory_space<vmem>>, %arg10: memref<32x128xf32, #tpu.memory_space<vmem>>) attributes {dimension_semantics = [#tpu.dimension_semantics<arbitrary>], iteration_bounds = array<i64: 1>, scalar_prefetch = 0 : i64, scratch_operands = 1 : i64, tpu.core_type = #tpu.core_type<tc>, window_params = [{pipeline_mode = #tpu.pipeline_mode<synchronous>, transform_indices = @transform_0, window_bounds = array<i64: 32, 128>}, {transform_indices = @transform_1, window_bounds = array<i64: 256, 128>}, {transform_indices = @transform_2, window_bounds = array<i64: 256, 1>}, {transform_indices = @transform_3, window_bounds = array<i64: 1, 256>}, {pipeline_mode = #tpu.pipeline_mode<synchronous>, transform_indices = @transform_4, window_bounds = array<i64: 128, 128>}, {pipeline_mode = #tpu.pipeline_mode<synchronous>, transform_indices = @transform_5, window_bounds = array<i64: 1, 128>}, {pipeline_mode = #tpu.pipeline_mode<synchronous>, transform_indices = @transform_6, window_bounds = array<i64: 128, 128>}, {pipeline_mode = #tpu.pipeline_mode<synchronous>, transform_indices = @transform_7, window_bounds = array<i64: 1, 128>}, {pipeline_mode = #tpu.pipeline_mode<synchronous>, transform_indices = @transform_8, window_bounds = array<i64: 32, 128>}]} {
    %c0_i32 = arith.constant 0 : i32
    %0 = arith.cmpi eq, %arg0, %c0_i32 : i32
    %1 = arith.extui %0 : i1 to i32
    %c0_i32_0 = arith.constant 0 : i32
    %2 = arith.cmpi ne, %1, %c0_i32_0 : i32
    scf.if %2 {
      %cst_16 = arith.constant 0.000000e+00 : f32
      %34 = vector.broadcast %cst_16 : f32 to vector<32x128xf32>
      %c0_17 = arith.constant 0 : index
      %c0_18 = arith.constant 0 : index
      %35 = vector.load %arg10[%c0_17, %c0_18] : memref<32x128xf32, #tpu.memory_space<vmem>>, vector<32x128xf32>
      tpu.vector_store %arg10[%c0_17, %c0_18], %34 {strides = array<i32>} : memref<32x128xf32, #tpu.memory_space<vmem>>, vector<32x128xf32>,
    } else {
    }
    %3 = tpu.iota {dimensions = array<i32: 1>} : vector<1x32xi32>
    %4 = tpu.iota {dimensions = array<i32: 0>} : vector<32x1xi32>
    %c0 = arith.constant 0 : index
    %c0_1 = arith.constant 0 : index
    %5 = vector.load %arg3[%c0, %c0_1] : memref<256x1xi32, #tpu.memory_space<vmem>>, vector<256x1xi32>
    %6 = vector.broadcast %3 : vector<1x32xi32> to vector<256x32xi32>
    %7 = vector.broadcast %5 : vector<256x1xi32> to vector<256x32xi32>
    %8 = arith.cmpi eq, %6, %7 : vector<256x32xi32>
    %9 = arith.extui %8 : vector<256x32xi1> to vector<256x32xi32>
    %10 = arith.sitofp %9 : vector<256x32xi32> to vector<256x32xf32>
    %11 = arith.truncf %10 : vector<256x32xf32> to vector<256x32xbf16>
    %c0_2 = arith.constant 0 : index
    %c0_3 = arith.constant 0 : index
    %12 = vector.load %arg4[%c0_2, %c0_3] : memref<1x256xi32, #tpu.memory_space<vmem>>, vector<1x256xi32>
    %13 = vector.broadcast %4 : vector<32x1xi32> to vector<32x256xi32>
    %14 = vector.broadcast %12 : vector<1x256xi32> to vector<32x256xi32>
    %15 = arith.cmpi eq, %13, %14 : vector<32x256xi32>
    %16 = arith.extui %15 : vector<32x256xi1> to vector<32x256xi32>
    %17 = arith.sitofp %16 : vector<32x256xi32> to vector<32x256xf32>
    %18 = arith.truncf %17 : vector<32x256xf32> to vector<32x256xbf16>
    %c0_4 = arith.constant 0 : index
    %c0_5 = arith.constant 0 : index
    %19 = vector.load %arg1[%c0_4, %c0_5] : memref<32x128xf32, #tpu.memory_space<vmem>>, vector<32x128xf32>
    %20 = arith.truncf %19 : vector<32x128xf32> to vector<32x128xbf16>
    %cst = arith.constant dense<0.000000e+00> : vector<256x128xf32>
    %21 = tpu.matmul %11, %20, %cst {dimension_numbers = #tpu.dot_dimension_numbers<[1], [0], [0], [1], [0, 0, 1, 1], [], []>} : vector<256x32xbf16>, vector<32x128xbf16>, vector<256x128xf32> -> vector<256x128xf32>
    %c0_6 = arith.constant 0 : index
    %c0_7 = arith.constant 0 : index
    %22 = vector.load %arg2[%c0_6, %c0_7] : memref<256x128xf32, #tpu.memory_space<vmem>>, vector<256x128xf32>
    %23 = arith.addf %21, %22 : vector<256x128xf32>
    %cst_8 = arith.constant 0.000000e+00 : f32
    %24 = vector.broadcast %cst_8 : f32 to vector<256x128xf32>
    %25 = arith.maximumf %23, %24 : vector<256x128xf32>
    %c0_9 = arith.constant 0 : index
    %c0_10 = arith.constant 0 : index
    %26 = vector.load %arg10[%c0_9, %c0_10] : memref<32x128xf32, #tpu.memory_space<vmem>>, vector<32x128xf32>
    %27 = arith.truncf %25 : vector<256x128xf32> to vector<256x128xbf16>
    %cst_11 = arith.constant dense<0.000000e+00> : vector<32x128xf32>
    %28 = tpu.matmul %18, %27, %cst_11 {dimension_numbers = #tpu.dot_dimension_numbers<[1], [0], [0], [1], [0, 0, 1, 1], [], []>} : vector<32x256xbf16>, vector<256x128xbf16>, vector<32x128xf32> -> vector<32x128xf32>
    %29 = arith.addf %26, %28 : vector<32x128xf32>
    %c0_12 = arith.constant 0 : index
    %c0_13 = arith.constant 0 : index
    %30 = vector.load %arg10[%c0_12, %c0_13] : memref<32x128xf32, #tpu.memory_space<vmem>>, vector<32x128xf32>
    tpu.vector_store %arg10[%c0_12, %c0_13], %29 {strides = array<i32>} : memref<32x128xf32, #tpu.memory_space<vmem>>, vector<32x128xf32>,
    %c0_i32_14 = arith.constant 0 : i32
    %31 = arith.cmpi eq, %arg0, %c0_i32_14 : i32
    %32 = arith.extui %31 : i1 to i32
    %c0_i32_15 = arith.constant 0 : i32
    %33 = arith.cmpi ne, %32, %c0_i32_15 : i32
    scf.if %33 {
      %c0_16 = arith.constant 0 : index
      %c0_17 = arith.constant 0 : index
      %34 = vector.load %arg1[%c0_16, %c0_17] : memref<32x128xf32, #tpu.memory_space<vmem>>, vector<32x128xf32>
      %cst_18 = arith.constant 1.000000e+00 : f32
      %35 = vector.broadcast %cst_18 : f32 to vector<32x128xf32>
      %36 = arith.mulf %35, %34 : vector<32x128xf32>
      %c0_19 = arith.constant 0 : index
      %c0_20 = arith.constant 0 : index
      %37 = vector.load %arg10[%c0_19, %c0_20] : memref<32x128xf32, #tpu.memory_space<vmem>>, vector<32x128xf32>
      %38 = arith.addf %36, %37 : vector<32x128xf32>
      %39 = arith.truncf %38 : vector<32x128xf32> to vector<32x128xbf16>
      %c0_21 = arith.constant 0 : index
      %c0_22 = arith.constant 0 : index
      %40 = vector.load %arg5[%c0_21, %c0_22] : memref<128x128xf32, #tpu.memory_space<vmem>>, vector<128x128xf32>
      %41 = arith.truncf %40 : vector<128x128xf32> to vector<128x128xbf16>
      %cst_23 = arith.constant dense<0.000000e+00> : vector<32x128xf32>
      %42 = tpu.matmul %39, %41, %cst_23 {dimension_numbers = #tpu.dot_dimension_numbers<[1], [0], [0], [1], [0, 0, 1, 1], [], []>} : vector<32x128xbf16>, vector<128x128xbf16>, vector<32x128xf32> -> vector<32x128xf32>
      %c0_24 = arith.constant 0 : index
      %c0_25 = arith.constant 0 : index
      %43 = vector.load %arg6[%c0_24, %c0_25] : memref<1x128xf32, #tpu.memory_space<vmem>>, vector<1x128xf32>
      %44 = vector.broadcast %43 : vector<1x128xf32> to vector<32x128xf32>
      %45 = arith.addf %42, %44 : vector<32x128xf32>
      %cst_26 = arith.constant 0.000000e+00 : f32
      %46 = vector.broadcast %cst_26 : f32 to vector<32x128xf32>
      %47 = arith.maximumf %45, %46 : vector<32x128xf32>
      %48 = arith.truncf %47 : vector<32x128xf32> to vector<32x128xbf16>
      %c0_27 = arith.constant 0 : index
      %c0_28 = arith.constant 0 : index
      %49 = vector.load %arg7[%c0_27, %c0_28] : memref<128x128xf32, #tpu.memory_space<vmem>>, vector<128x128xf32>
      %50 = arith.truncf %49 : vector<128x128xf32> to vector<128x128xbf16>
      %cst_29 = arith.constant dense<0.000000e+00> : vector<32x128xf32>
      %51 = tpu.matmul %48, %50, %cst_29 {dimension_numbers = #tpu.dot_dimension_numbers<[1], [0], [0], [1], [0, 0, 1, 1], [], []>} : vector<32x128xbf16>, vector<128x128xbf16>, vector<32x128xf32> -> vector<32x128xf32>
      %c0_30 = arith.constant 0 : index
      %c0_31 = arith.constant 0 : index
      %52 = vector.load %arg8[%c0_30, %c0_31] : memref<1x128xf32, #tpu.memory_space<vmem>>, vector<1x128xf32>
      %53 = vector.broadcast %52 : vector<1x128xf32> to vector<32x128xf32>
      %54 = arith.addf %51, %53 : vector<32x128xf32>
      %c0_32 = arith.constant 0 : index
      %c0_33 = arith.constant 0 : index
      %55 = vector.load %arg9[%c0_32, %c0_33] : memref<32x128xf32, #tpu.memory_space<vmem>>, vector<32x128xf32>
      tpu.vector_store %arg9[%c0_32, %c0_33], %54 {strides = array<i32>} : memref<32x128xf32, #tpu.memory_space<vmem>>, vector<32x128xf32>,
    } else {
    }
    return
  }
  func.func @transform_0(%arg0: i32) -> (i32, i32) {
    %c0_i32 = arith.constant 0 : i32
    %c0_i32_0 = arith.constant 0 : i32
    %c0_i32_1 = arith.constant 0 : i32
    return %c0_i32, %c0_i32_0 : i32, i32
  }
  func.func @transform_1(%arg0: i32) -> (i32, i32) {
    %c0_i32 = arith.constant 0 : i32
    %c0_i32_0 = arith.constant 0 : i32
    return %arg0, %c0_i32 : i32, i32
  }
  func.func @transform_2(%arg0: i32) -> (i32, i32) {
    %c0_i32 = arith.constant 0 : i32
    %c0_i32_0 = arith.constant 0 : i32
    return %arg0, %c0_i32 : i32, i32
  }
  func.func @transform_3(%arg0: i32) -> (i32, i32) {
    %c0_i32 = arith.constant 0 : i32
    %c0_i32_0 = arith.constant 0 : i32
    return %c0_i32, %arg0 : i32, i32
  }
  func.func @transform_4(%arg0: i32) -> (i32, i32) {
    %c0_i32 = arith.constant 0 : i32
    %c0_i32_0 = arith.constant 0 : i32
    %c0_i32_1 = arith.constant 0 : i32
    return %c0_i32, %c0_i32_0 : i32, i32
  }
  func.func @transform_5(%arg0: i32) -> (i32, i32) {
    %c0_i32 = arith.constant 0 : i32
    %c0_i32_0 = arith.constant 0 : i32
    %c0_i32_1 = arith.constant 0 : i32
    return %c0_i32, %c0_i32_0 : i32, i32
  }
  func.func @transform_6(%arg0: i32) -> (i32, i32) {
    %c0_i32 = arith.constant 0 : i32
    %c0_i32_0 = arith.constant 0 : i32
    %c0_i32_1 = arith.constant 0 : i32
    return %c0_i32, %c0_i32_0 : i32, i32
  }
  func.func @transform_7(%arg0: i32) -> (i32, i32) {
    %c0_i32 = arith.constant 0 : i32
    %c0_i32_0 = arith.constant 0 : i32
    %c0_i32_1 = arith.constant 0 : i32
    return %c0_i32, %c0_i32_0 : i32, i32
  }
  func.func @transform_8(%arg0: i32) -> (i32, i32) {
    %c0_i32 = arith.constant 0 : i32
    %c0_i32_0 = arith.constant 0 : i32
    %c0_i32_1 = arith.constant 0 : i32
    return %c0_i32, %c0_i32_0 : i32, i32
  }
}

</mosaic_0001>

<bundles_post_ra>
// kernel: tpu_custom_call.1
= control target key start
LH: loop header
LB: loop body
LE: loop exit
PB: predicated region body
PF: predicated region fallthrough
CT: control target
= control target key end

     0   :  { %13 = vsyncpa [#allocation4], 0  ;;  %s1674_s0 = inlined_call_operand.hbm [shape: f32[32,128], index: 0, kind: input, shape index: {}]   ;;  %s1675_s1 = inlined_call_operand.vmem [shape: f32[256,128], index: 1, kind: input, shape index: {}]   ;;  %s1676_s2 = inlined_call_operand.vmem [shape: s32[256,1], index: 2, kind: input, shape index: {}]   ;;  %s1677_s3 = inlined_call_operand.vmem [shape: s32[1,256], index: 3, kind: input, shape index: {}]   ;;  %s1678_s4 = inlined_call_operand.hbm [shape: f32[128,128], index: 4, kind: input, shape index: {}]   ;;  %s1679_s5 = inlined_call_operand.vmem [shape: f32[1,128], index: 5, kind: input, shape index: {}]   ;;  %s1680_s6 = inlined_call_operand.hbm [shape: f32[128,128], index: 6, kind: input, shape index: {}]   ;;  %s1681_s7 = inlined_call_operand.vmem [shape: f32[1,128], index: 7, kind: input, shape index: {}]   ;;  %s1682_s8 = inlined_call_operand.hbm [shape: f32[32,128], index: 8, kind: output, shape index: {}]  }
   0x1   :  { %14 = vsyncpa [#allocation7], 0 }
   0x2   :  { %15 = vsyncpa [#allocation5], 0  ;;  %s1231_s27 = smov [#allocation6]   ;;  %s1232_s29 = smov [#allocation3]  }
   0x3   :  { %s39_s28 = sshll.u32 %s1231_s27, 4  ;;  %s21_s30 = sshll.u32 %s1232_s29, 4  ;;  %s40_s28 = int_to_ptr.vmem [resolvable:$true] %s39_s28  ;;  %s22_s30 = int_to_ptr.vmem [resolvable:$true] %s21_s30 }
   0x4   :  { %s1153_s9 = scalar_lea.vmem %s40_s28, 2048  ;;  %p1158_p1 = scmp.lt.s32.totalorder %s40_s28, %s40_s28 }
   0x5   :  { %p1154_p0 = scmp.ne.s32.totalorder %s40_s28, %s1153_s9  ;;  %p1159_p2 = scmp.lt.s32.totalorder %s1153_s9, %s1153_s9 }
   0x7   :  { %p1160_p3 = por %p1159_p2, %p1158_p1 }
   0x9   :  { %p1161_p4 = pnand %p1160_p3, %p1154_p0 }
   0xb   :  { %1164 = shalt.err (!%p1161_p4)
}
   0xc   :  { %s1233_s10 = smov 128   ;;  %s1234_s11 = smov 8  }
   0xd   :  { %45 = dma.hbm_to_vmem [thread:$0]  %s1678_s4, 2048, %s40_s28, [#allocation7], %s1233_s10, %s1233_s10, %s1234_s11  }
   0xe   :  { %s1173_s14 = scalar_lea.vmem %s22_s30, 512  ;;  %p1178_p6 = scmp.lt.s32.totalorder %s22_s30, %s22_s30 }
   0xf   :  { %p1174_p5 = scmp.ne.s32.totalorder %s22_s30, %s1173_s14  ;;  %p1179_p7 = scmp.lt.s32.totalorder %s1173_s14, %s1173_s14 }
  0x11   :  { %p1180_p8 = por %p1179_p7, %p1178_p6 }
  0x13   :  { %p1181_p9 = pnand %p1180_p8, %p1174_p5 }
  0x15   :  { %1184 = shalt.err (!%p1181_p9)
}
  0x16   :  { %27 = dma.hbm_to_vmem [thread:$0]  %s1674_s0, 512, %s22_s30, [#allocation4], %s1233_s10, %s1233_s10, %s1234_s11  }
  0x17   :  { %s1235_s17 = smov [#allocation8]  }
  0x18   :  { %s53_s18 = sshll.u32 %s1235_s17, 4  ;;  %s54_s18 = int_to_ptr.vmem [resolvable:$true] %s53_s18 }
  0x19   :  { %s1193_s19 = scalar_lea.vmem %s54_s18, 2048  ;;  %p1198_p11 = scmp.lt.s32.totalorder %s54_s18, %s54_s18 }
  0x1a   :  { %p1194_p10 = scmp.ne.s32.totalorder %s54_s18, %s1193_s19  ;;  %p1199_p12 = scmp.lt.s32.totalorder %s1193_s19, %s1193_s19 }
  0x1c   :  { %p1200_p13 = por %p1199_p12, %p1198_p11 }
  0x1e   :  { %p1201_p0 = pnand %p1200_p13, %p1194_p10 }
  0x20   :  { %1204 = shalt.err (!%p1201_p0)
}
  0x21   :  { %59 = dma.hbm_to_vmem [thread:$0]  %s1680_s6, 2048, %s54_s18, [#allocation7], %s1233_s10, %s1233_s10, %s1234_s11  }
  0x22   :  { %1225 = dma.done.wait [#allocation4], 512  }
  0x23   :  { %1226 = vsyncadd [#allocation4], 4294966784 }
  0x24   :  { %1227 = dma.done.wait [#allocation7], 4096  }
  0x25   :  { %1228 = vsyncadd [#allocation7], 4294963200  ;;  %v1236_v0 = vmov 0   ;;  %v89_v1 = vld [vmem:[%s1676_s2 + $0x10] sm:$0xff]  ;;  %v87_v2 = vld [vmem:[%s1676_s2] sm:$0xff]  ;;  %v80_v39 = vlaneseq  ;;  %vm402_vm4 = vcmask 261120  }
  0x26   :  { %1144 = vset.pattern.permute.xlu1 %v1236_v0  ;;  %1143 = vset.pattern.permute.xlu0 %v1236_v0  ;;  %v90_v3 = vld [vmem:[%s1676_s2 + $0x18] sm:$0xff]  ;;  %v88_v4 = vld [vmem:[%s1676_s2 + $0x8] sm:$0xff]  ;;  %v91_v6 = vld [vmem:[%s1676_s2 + $0x20] sm:$0xff]  ;;  %v1237_v45 = vmov 0.0  }
  0x27   :  { %126 = vperm.xlu1 %1144, %v89_v1   ;;  %120 = vperm.xlu0 %1143, %v87_v2   ;;  %v92_v5 = vld [vmem:[%s1676_s2 + $0x28] sm:$0xff]  ;;  %v94_v7 = vld [vmem:[%s1676_s2 + $0x38] sm:$0xff]  ;;  %v93_v8 = vld [vmem:[%s1676_s2 + $0x30] sm:$0xff]  ;;  %v1412_v40 = vand.u32 127, %v80_v39 }
  0x28   :  { %v1327_v9 = vld [vmem:[#allocation3 + $0x10] sm:$0xff]  ;;  %v1329_v10 = vld [vmem:[#allocation3 + $0x18] sm:$0xff]  ;;  %v1331_v11 = vld [vmem:[#allocation3] sm:$0xff] }
  0x29   :  { %v1333_v12 = vld [vmem:[#allocation3 + $0x8] sm:$0xff]  ;;  %v369_v13 = vpack.c.bf16 %v1329_v10, %v1327_v9  ;;  %v95_v16 = vld [vmem:[%s1676_s2 + $0x40] sm:$0xff]  ;;  %v98_v17 = vld [vmem:[%s1676_s2 + $0x58] sm:$0xff] }
  0x2a   :  { %v368_v14 = vpack.c.bf16 %v1333_v12, %v1331_v11  ;;  %v96_v15 = vld [vmem:[%s1676_s2 + $0x48] sm:$0xff]  ;;  %v97_v18 = vld [vmem:[%s1676_s2 + $0x50] sm:$0xff]  ;;  %v99_v20 = vld [vmem:[%s1676_s2 + $0x60] sm:$0xff] }
  0x2b   :  { %129 = vperm.xlu1 %1144, %v90_v3   ;;  %123 = vperm.xlu0 %1143, %v88_v4   ;;  %v100_v19 = vld [vmem:[%s1676_s2 + $0x68] sm:$0xff]  ;;  %v102_v21 = vld [vmem:[%s1676_s2 + $0x78] sm:$0xff]  ;;  %v101_v22 = vld [vmem:[%s1676_s2 + $0x70] sm:$0xff] }
  0x2c   :  { %1058 = vmatprep.subr.bf16.mxu0 %v369_v13  ;;  %v104_v23 = vld [vmem:[%s1676_s2 + $0x88] sm:$0xff]  ;;  %v103_v24 = vld [vmem:[%s1676_s2 + $0x80] sm:$0xff]  ;;  %v106_v25 = vld [vmem:[%s1676_s2 + $0x98] sm:$0xff] }
  0x2d   :  { %1059 = vmatpush3.bf16.msra.mxu0 %v369_v13  ;;  %v105_v26 = vld [vmem:[%s1676_s2 + $0x90] sm:$0xff]  ;;  %v108_v27 = vld [vmem:[%s1676_s2 + $0xa8] sm:$0xff]  ;;  %v107_v28 = vld [vmem:[%s1676_s2 + $0xa0] sm:$0xff] }
  0x2e   :  { %1060 = vmatprep.subr.bf16.mxu0 %v368_v14  ;;  %v110_v29 = vld [vmem:[%s1676_s2 + $0xb8] sm:$0xff]  ;;  %v109_v30 = vld [vmem:[%s1676_s2 + $0xb0] sm:$0xff]  ;;  %v112_v31 = vld [vmem:[%s1676_s2 + $0xc8] sm:$0xff] }
  0x2f   :  { %135 = vperm.xlu1 %1144, %v92_v5   ;;  %132 = vperm.xlu0 %1143, %v91_v6   ;;  %v111_v32 = vld [vmem:[%s1676_s2 + $0xc0] sm:$0xff]  ;;  %v114_v33 = vld [vmem:[%s1676_s2 + $0xd8] sm:$0xff]  ;;  %v113_v34 = vld [vmem:[%s1676_s2 + $0xd0] sm:$0xff] }
  0x30   :  { %v116_v35 = vld [vmem:[%s1676_s2 + $0xe8] sm:$0xff]  ;;  %v115_v36 = vld [vmem:[%s1676_s2 + $0xe0] sm:$0xff]  ;;  %v118_v37 = vld [vmem:[%s1676_s2 + $0xf8] sm:$0xff] }
  0x31   :  { %1061 = vmatpush3.bf16.msra.mxu0 %v368_v14  ;;  %v117_v38 = vld [vmem:[%s1676_s2 + $0xf0] sm:$0xff] }
  0x33   :  { %141 = vperm.xlu1 %1144, %v94_v7   ;;  %138 = vperm.xlu0 %1143, %v93_v8  }
  0x37   :  { %147 = vperm.xlu1 %1144, %v96_v15   ;;  %144 = vperm.xlu0 %1143, %v95_v16  }
  0x3b   :  { %153 = vperm.xlu1 %1144, %v98_v17   ;;  %150 = vperm.xlu0 %1143, %v97_v18  }
  0x3f   :  { %159 = vperm.xlu1 %1144, %v100_v19   ;;  %156 = vperm.xlu0 %1143, %v99_v20  }
  0x43   :  { %165 = vperm.xlu1 %1144, %v102_v21   ;;  %162 = vperm.xlu0 %1143, %v101_v22  }
  0x47   :  { %171 = vperm.xlu1 %1144, %v104_v23   ;;  %168 = vperm.xlu0 %1143, %v103_v24  }
  0x4b   :  { %177 = vperm.xlu1 %1144, %v106_v25   ;;  %174 = vperm.xlu0 %1143, %v105_v26  }
  0x4f   :  { %183 = vperm.xlu1 %1144, %v108_v27   ;;  %180 = vperm.xlu0 %1143, %v107_v28  }
  0x53   :  { %189 = vperm.xlu1 %1144, %v110_v29   ;;  %186 = vperm.xlu0 %1143, %v109_v30  }
  0x57   :  { %195 = vperm.xlu1 %1144, %v112_v31   ;;  %192 = vperm.xlu0 %1143, %v111_v32  }
  0x5b   :  { %201 = vperm.xlu1 %1144, %v114_v33   ;;  %198 = vperm.xlu0 %1143, %v113_v34  }
  0x5f   :  { %207 = vperm.xlu1 %1144, %v116_v35   ;;  %204 = vperm.xlu0 %1143, %v115_v36  }
  0x63   :  { %213 = vperm.xlu1 %1144, %v118_v37   ;;  %210 = vperm.xlu0 %1143, %v117_v38  }
  0xa2   :  { %v127_v41 = vpop.permute.xlu1 %126  ;;  %v121_v42 = vpop.permute.xlu0 %120 }
  0xa3   :  { %vm217_vm0 = vcmp.eq.s32.totalorder %v1412_v40, %v127_v41  ;;  %vm215_vm1 = vcmp.eq.s32.totalorder %v1412_v40, %v121_v42 }
  0xa4   :  { %v928_v46 = vsel %vm217_vm0, 1.0, %v1237_v45  ;;  %v926_v47 = vsel %vm215_vm1, 1.0, %v1237_v45 }
  0xa6   :  { %v130_v43 = vpop.permute.xlu1 %129  ;;  %v124_v44 = vpop.permute.xlu0 %123 }
  0xa7   :  { %vm218_vm2 = vcmp.eq.s32.totalorder %v1412_v40, %v130_v43  ;;  %vm216_vm3 = vcmp.eq.s32.totalorder %v1412_v40, %v124_v44 }
  0xa8   :  { %v929_v48 = vsel %vm218_vm2, 1.0, %v1237_v45  ;;  %v927_v49 = vsel %vm216_vm3, 1.0, %v1237_v45 }
  0xa9   :  { %v312_v50 = vpack.c.bf16 %v929_v48, %v928_v46  ;;  %v311_v51 = vpack.c.bf16 %v927_v49, %v926_v47 }
  0xaa   :  { %v136_v52 = vpop.permute.xlu1 %135  ;;  %v133_v53 = vpop.permute.xlu0 %132 }
  0xab   :  { %vm220_vm5 = vcmp.eq.s32.totalorder %v1412_v40, %v136_v52  ;;  %vm219_vm6 = vcmp.eq.s32.totalorder %v1412_v40, %v133_v53  ;;  %1062 = vmatprep.mubr.msk.bf16.mxu0 %vm402_vm4, %v311_v51 }
  0xac   :  { %v931_v54 = vsel %vm220_vm5, 1.0, %v1237_v45  ;;  %v930_v55 = vsel %vm219_vm6, 1.0, %v1237_v45  ;;  %1063 = vmatmul.mubr.msk.bf16.vlgmr.msra.gmra.mxu0 %vm402_vm4, %v312_v50 }
  0xad   :  { %v313_v56 = vpack.c.bf16 %v931_v54, %v930_v55 }
  0xae   :  { %v142_v57 = vpop.permute.xlu1 %141  ;;  %v139_v58 = vpop.permute.xlu0 %138 }
  0xaf   :  { %vm222_vm7 = vcmp.eq.s32.totalorder %v1412_v40, %v142_v57  ;;  %vm221_vm8 = vcmp.eq.s32.totalorder %v1412_v40, %v139_v58  ;;  %1066 = vmatprep.mubr.msk.bf16.mxu0 %vm402_vm4, %v313_v56 }
  0xb0   :  { %v933_v59 = vsel %vm222_vm7, 1.0, %v1237_v45  ;;  %v932_v60 = vsel %vm221_vm8, 1.0, %v1237_v45 }
  0xb1   :  { %v314_v61 = vpack.c.bf16 %v933_v59, %v932_v60 }
  0xb2   :  { %v148_v62 = vpop.permute.xlu1 %147  ;;  %v145_v63 = vpop.permute.xlu0 %144 }
  0xb3   :  { %vm224_vm9 = vcmp.eq.s32.totalorder %v1412_v40, %v148_v62  ;;  %vm223_vm10 = vcmp.eq.s32.totalorder %v1412_v40, %v145_v63 }
  0xb4   :  { %v935_v0 = vsel %vm224_vm9, 1.0, %v1237_v45  ;;  %v934_v1 = vsel %vm223_vm10, 1.0, %v1237_v45  ;;  %1067 = vmatmul.mubr.msk.bf16.gmra.mxu0 %vm402_vm4, %v314_v61 }
  0xb5   :  { %v315_v2 = vpack.c.bf16 %v935_v0, %v934_v1  ;;  %v83_v1 = vshrl.u32 %v80_v39, 7 }
  0xb6   :  { %v154_v3 = vpop.permute.xlu1 %153  ;;  %v151_v4 = vpop.permute.xlu0 %150 }
  0xb7   :  { %vm226_vm11 = vcmp.eq.s32.totalorder %v1412_v40, %v154_v3  ;;  %vm225_vm12 = vcmp.eq.s32.totalorder %v1412_v40, %v151_v4  ;;  %1070 = vmatprep.mubr.msk.bf16.mxu0 %vm402_vm4, %v315_v2  ;;  %v334_v2 = vsub.s32 1, %v83_v1  ;;  %v327_v3 = vld [vmem:[%s1677_s3] sm:$0x3]  ;;  %v330_v4 = vsub.s32 0, %v83_v1 }
  0xb8   :  { %v937_v5 = vsel %vm226_vm11, 1.0, %v1237_v45  ;;  %v936_v6 = vsel %vm225_vm12, 1.0, %v1237_v45  ;;  %v85_v39 = vadd.s32 16, %v83_v1 }
  0xb9   :  { %v316_v7 = vpack.c.bf16 %v937_v5, %v936_v6  ;;  %v84_v5 = vadd.s32 8, %v83_v1  ;;  %v335_v6 = vrot.slane %v327_v3, %v334_v2 }
  0xba   :  { %v160_v8 = vpop.permute.xlu1 %159  ;;  %v157_v13 = vpop.permute.xlu0 %156 }
  0xbb   :  { %vm228_vm13 = vcmp.eq.s32.totalorder %v1412_v40, %v160_v8  ;;  %vm227_vm14 = vcmp.eq.s32.totalorder %v1412_v40, %v157_v13  ;;  %v86_v8 = vadd.s32 24, %v83_v1  ;;  %v742_v13 = vld [vmem:[#allocation6 + $0x20] sm:$0xff] }
  0xbc   :  { %v939_v14 = vsel %vm228_vm13, 1.0, %v1237_v45  ;;  %v938_v15 = vsel %vm227_vm14, 1.0, %v1237_v45  ;;  %1071 = vmatmul.mubr.msk.bf16.gmra.mxu0 %vm402_vm4, %v316_v7  ;;  %v744_v7 = vld [vmem:[#allocation6 + $0x30] sm:$0xff] }
  0xbd   :  { %v317_v16 = vpack.c.bf16 %v939_v14, %v938_v15  ;;  %v372_v15 = vld [vmem:[%s1675_s1 + $0x10] sm:$0xff] }
  0xbe   :  { %v166_v17 = vpop.permute.xlu1 %165  ;;  %v163_v18 = vpop.permute.xlu0 %162 }
  0xbf   :  { %vm230_vm15 = vcmp.eq.s32.totalorder %v1412_v40, %v166_v17  ;;  %vm229_vm0 = vcmp.eq.s32.totalorder %v1412_v40, %v163_v18  ;;  %1074 = vmatprep.mubr.msk.bf16.mxu0 %vm402_vm4, %v317_v16  ;;  %v370_v18 = vld [vmem:[%s1675_s1] sm:$0xff] }
  0xc0   :  { %v941_v19 = vsel %vm230_vm15, 1.0, %v1237_v45  ;;  %v940_v20 = vsel %vm229_vm0, 1.0, %v1237_v45 }
  0xc1   :  { %v318_v21 = vpack.c.bf16 %v941_v19, %v940_v20  ;;  %v373_v19 = vld [vmem:[%s1675_s1 + $0x18] sm:$0xff] }
  0xc2   :  { %v172_v22 = vpop.permute.xlu1 %171  ;;  %v169_v23 = vpop.permute.xlu0 %168 }
  0xc3   :  { %vm232_vm1 = vcmp.eq.s32.totalorder %v1412_v40, %v172_v22  ;;  %vm231_vm2 = vcmp.eq.s32.totalorder %v1412_v40, %v169_v23  ;;  %v371_v22 = vld [vmem:[%s1675_s1 + $0x8] sm:$0xff] }
  0xc4   :  { %v943_v24 = vsel %vm232_vm1, 1.0, %v1237_v45  ;;  %v942_v25 = vsel %vm231_vm2, 1.0, %v1237_v45  ;;  %1075 = vmatmul.mubr.msk.bf16.gmra.mxu0 %vm402_vm4, %v318_v21  ;;  %vm337_vm2 = vcmp.eq.s32.totalorder %v83_v1, %v335_v6 }
  0xc5   :  { %v319_v26 = vpack.c.bf16 %v943_v24, %v942_v25 }
  0xc6   :  { %v178_v27 = vpop.permute.xlu1 %177  ;;  %v175_v28 = vpop.permute.xlu0 %174 }
  0xc7   :  { %vm234_vm3 = vcmp.eq.s32.totalorder %v1412_v40, %v178_v27  ;;  %vm233_vm5 = vcmp.eq.s32.totalorder %v1412_v40, %v175_v28  ;;  %1078 = vmatprep.mubr.msk.bf16.mxu0 %vm402_vm4, %v319_v26 }
  0xc8   :  { %v945_v29 = vsel %vm234_vm3, 1.0, %v1237_v45  ;;  %v944_v30 = vsel %vm233_vm5, 1.0, %v1237_v45  ;;  %vm339_vm3 = vcmp.eq.s32.totalorder %v84_v5, %v335_v6 }
  0xc9   :  { %v320_v31 = vpack.c.bf16 %v945_v29, %v944_v30  ;;  %vm982_vm5 = vmpackc.low %vm339_vm3, %vm337_vm2  ;;  %v376_v29 = vld [vmem:[%s1675_s1 + $0x30] sm:$0xff] }
  0xca   :  { %v184_v32 = vpop.permute.xlu1 %183  ;;  %v181_v33 = vpop.permute.xlu0 %180 }
  0xcb   :  { %vm236_vm6 = vcmp.eq.s32.totalorder %v1412_v40, %v184_v32  ;;  %vm235_vm7 = vcmp.eq.s32.totalorder %v1412_v40, %v181_v33 }
  0xcc   :  { %v947_v34 = vsel %vm236_vm6, 1.0, %v1237_v45  ;;  %v946_v35 = vsel %vm235_vm7, 1.0, %v1237_v45  ;;  %1079 = vmatmul.mubr.msk.bf16.gmra.mxu0 %vm402_vm4, %v320_v31 }
  0xcd   :  { %v321_v36 = vpack.c.bf16 %v947_v34, %v946_v35  ;;  %v374_v35 = vld [vmem:[%s1675_s1 + $0x20] sm:$0xff] }
  0xce   :  { %v190_v37 = vpop.permute.xlu1 %189  ;;  %v187_v38 = vpop.permute.xlu0 %186 }
  0xcf   :  { %vm238_vm8 = vcmp.eq.s32.totalorder %v1412_v40, %v190_v37  ;;  %vm237_vm9 = vcmp.eq.s32.totalorder %v1412_v40, %v187_v38  ;;  %1082 = vmatprep.mubr.msk.bf16.mxu0 %vm402_vm4, %v321_v36  ;;  %v377_v36 = vld [vmem:[%s1675_s1 + $0x38] sm:$0xff] }
  0xd0   :  { %v949_v41 = vsel %vm238_vm8, 1.0, %v1237_v45  ;;  %v948_v42 = vsel %vm237_vm9, 1.0, %v1237_v45  ;;  %vm341_vm8 = vcmp.eq.s32.totalorder %v85_v39, %v335_v6  ;;  %vm343_vm9 = vcmp.eq.s32.totalorder %v86_v8, %v335_v6 }
  0xd1   :  { %v322_v43 = vpack.c.bf16 %v949_v41, %v948_v42  ;;  %v375_v42 = vld [vmem:[%s1675_s1 + $0x28] sm:$0xff] }
  0xd2   :  { %v196_v44 = vpop.permute.xlu1 %195  ;;  %v193_v46 = vpop.permute.xlu0 %192 }
  0xd3   :  { %vm240_vm10 = vcmp.eq.s32.totalorder %v1412_v40, %v196_v44  ;;  %vm239_vm11 = vcmp.eq.s32.totalorder %v1412_v40, %v193_v46 }
  0xd4   :  { %v951_v47 = vsel %vm240_vm10, 1.0, %v1237_v45  ;;  %v950_v48 = vsel %vm239_vm11, 1.0, %v1237_v45  ;;  %1083 = vmatmul.mubr.msk.bf16.gmra.mxu0 %vm402_vm4, %v322_v43 }
  0xd5   :  { %v323_v49 = vpack.c.bf16 %v951_v47, %v950_v48 }
  0xd6   :  { %v202_v50 = vpop.permute.xlu1 %201  ;;  %v199_v51 = vpop.permute.xlu0 %198 }
  0xd7   :  { %vm242_vm12 = vcmp.eq.s32.totalorder %v1412_v40, %v202_v50  ;;  %vm241_vm13 = vcmp.eq.s32.totalorder %v1412_v40, %v199_v51  ;;  %1086 = vmatprep.mubr.msk.bf16.mxu0 %vm402_vm4, %v323_v49 }
  0xd8   :  { %v953_v52 = vsel %vm242_vm12, 1.0, %v1237_v45  ;;  %v952_v53 = vsel %vm241_vm13, 1.0, %v1237_v45  ;;  %vm1503_vm12 = vmpackc.low %vm343_vm9, %vm341_vm8 }
  0xd9   :  { %v324_v54 = vpack.c.bf16 %v953_v52, %v952_v53 }
  0xda   :  { %v208_v55 = vpop.permute.xlu1 %207  ;;  %v205_v56 = vpop.permute.xlu0 %204 }
  0xdb   :  { %vm244_vm14 = vcmp.eq.s32.totalorder %v1412_v40, %v208_v55  ;;  %vm243_vm15 = vcmp.eq.s32.totalorder %v1412_v40, %v205_v56 }
  0xdc   :  { %v955_v57 = vsel %vm244_vm14, 1.0, %v1237_v45  ;;  %v954_v58 = vsel %vm243_vm15, 1.0, %v1237_v45  ;;  %1087 = vmatmul.mubr.msk.bf16.gmra.mxu0 %vm402_vm4, %v324_v54 }
  0xdd   :  { %v325_v59 = vpack.c.bf16 %v955_v57, %v954_v58 }
  0xde   :  { %v214_v60 = vpop.permute.xlu1 %213  ;;  %v211_v61 = vpop.permute.xlu0 %210 }
  0xdf   :  { %vm246_vm0 = vcmp.eq.s32.totalorder %v1412_v40, %v214_v60  ;;  %vm245_vm1 = vcmp.eq.s32.totalorder %v1412_v40, %v211_v61  ;;  %1090 = vmatprep.mubr.msk.bf16.mxu0 %vm402_vm4, %v325_v59  ;;  %v331_v40 = vrot.slane %v327_v3, %v330_v4 }
  0xe0   :  { %v957_v62 = vsel %vm246_vm0, 1.0, %v1237_v45  ;;  %v956_v63 = vsel %vm245_vm1, 1.0, %v1237_v45  ;;  %v1238_v45 = vmov 1.0|1.0  }
  0xe1   :  { %v326_v0 = vpack.c.bf16 %v957_v62, %v956_v63  ;;  %vm336_vm6 = vcmp.eq.s32.totalorder %v83_v1, %v331_v40  ;;  %vm338_vm7 = vcmp.eq.s32.totalorder %v84_v5, %v331_v40  ;;  %983 = vmatprep.mubr.msk.bf16.mxu1 %vm982_vm5, %v1238_v45  ;;  %vm340_vm10 = vcmp.eq.s32.totalorder %v85_v39, %v331_v40 }
  0xe2   :  { %vm342_vm11 = vcmp.eq.s32.totalorder %v86_v8, %v331_v40 }
  0xe3   :  { %vm1507_vm13 = vmpackc.low %vm342_vm11, %vm340_vm10 }
  0xe4   :  { %1091 = vmatmul.mubr.msk.bf16.gmra.mxu0 %vm402_vm4, %v326_v0  ;;  %vm1499_vm4 = vmpackc.low %vm338_vm7, %vm336_vm6 }
 0x16c   :  { %v1064_v16 = vpop.f32.mrf.mxu0 }
 0x16d   :  { %v494_v20 = vadd.f32 %v1064_v16, %v372_v15  ;;  %v385_v15 = vld [vmem:[%s1675_s1 + $0x78] sm:$0xff]  ;;  %v400_v16 = vld [vmem:[%s1675_s1 + $0xf0] sm:$0xff] }
 0x16e   :  { %v485_v17 = vpop.f32.mrf.mxu0 }
 0x16f   :  { %v486_v23 = vadd.f32 %v485_v17, %v370_v18  ;;  %v614_v26 = vmax.f32 %v494_v20, 0.0  ;;  %v384_v18 = vld [vmem:[%s1675_s1 + $0x70] sm:$0xff] }
 0x170   :  { %v1065_v21 = vpop.f32.mrf.mxu0 }
 0x171   :  { %v497_v24 = vadd.f32 %v1065_v21, %v373_v19  ;;  %v612_v31 = vmax.f32 %v486_v23, 0.0  ;;  %v398_v21 = vld [vmem:[%s1675_s1 + $0xe0] sm:$0xff]  ;;  %v383_v23 = vld [vmem:[%s1675_s1 + $0x68] sm:$0xff] }
 0x172   :  { %v488_v25 = vpop.f32.mrf.mxu0 }
 0x173   :  { %v615_v27 = vmax.f32 %v497_v24, 0.0  ;;  %v489_v28 = vadd.f32 %v488_v25, %v371_v22  ;;  %v401_v22 = vld [vmem:[%s1675_s1 + $0xf8] sm:$0xff] }
 0x174   :  { %v1068_v30 = vpop.f32.mrf.mxu0 }
 0x175   :  { %v1526_v32 = vpack.c.bf16 %v615_v27, %v614_v26  ;;  %v613_v33 = vmax.f32 %v489_v28, 0.0  ;;  %v510_v38 = vadd.f32 %v1068_v30, %v376_v29  ;;  %v397_v26 = vld [vmem:[%s1675_s1 + $0xd8] sm:$0xff]  ;;  %v399_v28 = vld [vmem:[%s1675_s1 + $0xe8] sm:$0xff]  ;;  %v382_v29 = vld [vmem:[%s1675_s1 + $0x60] sm:$0xff] }
 0x176   :  { %v501_v34 = vpop.f32.mrf.mxu0 }
 0x177   :  { %v1534_v37 = vpack.c.bf16 %v613_v33, %v612_v31  ;;  %v502_v43 = vadd.f32 %v501_v34, %v374_v35  ;;  %v618_v47 = vmax.f32 %v510_v38, 0.0  ;;  %v396_v35 = vld [vmem:[%s1675_s1 + $0xd0] sm:$0xff]  ;;  %v381_v38 = vld [vmem:[%s1675_s1 + $0x58] sm:$0xff] }
 0x178   :  { %v1069_v41 = vpop.f32.mrf.mxu0 }
 0x179   :  { %v513_v44 = vadd.f32 %v1069_v41, %v377_v36  ;;  %v616_v51 = vmax.f32 %v502_v43, 0.0 }
 0x17a   :  { %v504_v46 = vpop.f32.mrf.mxu0 }
 0x17b   :  { %v619_v48 = vmax.f32 %v513_v44, 0.0  ;;  %v505_v49 = vadd.f32 %v504_v46, %v375_v42 }
 0x17c   :  { %v1539_v50 = vpop.f32.mrf.mxu0 }
 0x17d   :  { %v1541_v52 = vpack.c.bf16 %v619_v48, %v618_v47  ;;  %v617_v53 = vmax.f32 %v505_v49, 0.0  ;;  %v395_v48 = vld [vmem:[%s1675_s1 + $0xc8] sm:$0xff]  ;;  %v380_v49 = vld [vmem:[%s1675_s1 + $0x50] sm:$0xff] }
 0x17e   :  { %v1543_v54 = vpop.f32.mrf.mxu0 }
 0x17f   :  { %v1545_v55 = vpack.c.bf16 %v617_v53, %v616_v51 }
 0x180   :  { %v1073_v56 = vpop.f32.mrf.mxu0 }
 0x182   :  { %v1547_v57 = vpop.f32.mrf.mxu0 }
 0x184   :  { %v1076_v58 = vpop.f32.mrf.mxu0 }
 0x185   :  { %v542_v25 = vadd.f32 %v1076_v58, %v384_v18 }
 0x186   :  { %v533_v59 = vpop.f32.mrf.mxu0 }
 0x187   :  { %v626_v46 = vmax.f32 %v542_v25, 0.0  ;;  %v534_v47 = vadd.f32 %v533_v59, %v382_v29  ;;  %v379_v59 = vld [vmem:[%s1675_s1 + $0x48] sm:$0xff] }
 0x188   :  { %v1077_v60 = vpop.f32.mrf.mxu0 }
 0x189   :  { %v545_v19 = vadd.f32 %v1077_v60, %v385_v15 }
 0x18a   :  { %v536_v61 = vpop.f32.mrf.mxu0 }
 0x18b   :  { %v627_v33 = vmax.f32 %v545_v19, 0.0  ;;  %v537_v34 = vadd.f32 %v536_v61, %v383_v23  ;;  %v529_v61 = vadd.f32 %v1073_v56, %v381_v38  ;;  %v393_v56 = vld [vmem:[%s1675_s1 + $0xb8] sm:$0xff] }
 0x18c   :  { %v1549_v62 = vpop.f32.mrf.mxu0 }
 0x18d   :  { %v625_v15 = vmax.f32 %v537_v34, 0.0 }
 0x18e   :  { %v1551_v63 = vpop.f32.mrf.mxu0 }
 0x190   :  { %v1553_v0 = vpop.f32.mrf.mxu0 }
 0x192   :  { %v1555_v1 = vpop.f32.mrf.mxu0 }
 0x194   :  { %v1557_v2 = vpop.f32.mrf.mxu0 }
 0x196   :  { %v1559_v3 = vpop.f32.mrf.mxu0 }
 0x198   :  { %v1085_v4 = vpop.f32.mrf.mxu0 }
 0x19a   :  { %v1561_v5 = vpop.f32.mrf.mxu0 }
 0x19c   :  { %v1088_v6 = vpop.f32.mrf.mxu0 }
 0x19d   :  { %v590_v51 = vadd.f32 %v1088_v6, %v396_v35  ;;  %v526_v6 = vadd.f32 %v1539_v50, %v380_v49  ;;  %v392_v50 = vld [vmem:[%s1675_s1 + $0xb0] sm:$0xff] }
 0x19e   :  { %v581_v40 = vpop.f32.mrf.mxu0 }
 0x19f   :  { %v622_v29 = vmax.f32 %v526_v6, 0.0  ;;  %v749_v6 = vld [vmem:[#allocation6 + $0x58] sm:$0xff] }
 0x1a0   :  { %v1089_v39 = vpop.f32.mrf.mxu0 }
 0x1a1   :  { %v593_v41 = vadd.f32 %v1089_v39, %v397_v26  ;;  %v394_v39 = vld [vmem:[%s1675_s1 + $0xc0] sm:$0xff]  ;;  %v577_v26 = vadd.f32 %v1085_v4, %v393_v56  ;;  %v745_v56 = vld [vmem:[#allocation6 + $0x38] sm:$0xff] }
 0x1a2   :  { %v584_v8 = vpop.f32.mrf.mxu0  ;;  %v582_v23 = vadd.f32 %v581_v40, %v394_v39  ;;  %v574_v40 = vadd.f32 %v1557_v2, %v392_v50  ;;  %v390_v4 = vld [vmem:[%s1675_s1 + $0xa0] sm:$0xff] }
 0x1a3   :  { %v585_v18 = vadd.f32 %v584_v8, %v395_v48  ;;  %v521_v8 = vadd.f32 %v1547_v57, %v379_v59  ;;  %v635_v35 = vmax.f32 %v577_v26, 0.0  ;;  %v566_v2 = vadd.f32 %v1559_v3, %v390_v4  ;;  %v387_v48 = vld [vmem:[%s1675_s1 + $0x88] sm:$0xff]  ;;  %v386_v3 = vld [vmem:[%s1675_s1 + $0x80] sm:$0xff]  ;;  %v753_v59 = vld [vmem:[#allocation6 + $0x78] sm:$0xff] }
 0x1a4   :  { %v1092_v17 = vpop.f32.mrf.mxu0  ;;  %v838_v26 = vld [vmem:[#allocation8 + $0x70] sm:$0xff]  ;;  %v833_v4 = vld [vmem:[#allocation8 + $0x48] sm:$0xff] }
 0x1a5   :  { %v606_v24 = vadd.f32 %v1092_v17, %v400_v16  ;;  %v655_v16 = vpack.c.bf16 %v627_v33, %v626_v46  ;;  %v639_v17 = vmax.f32 %v593_v41, 0.0  ;;  %v636_v33 = vmax.f32 %v582_v23, 0.0  ;;  %v389_v41 = vld [vmem:[%s1675_s1 + $0x98] sm:$0xff] }
 0x1a6   :  { %v597_v20 = vpop.f32.mrf.mxu0  ;;  %v621_v34 = vmax.f32 %v521_v8, 0.0  ;;  %v561_v46 = vadd.f32 %v1553_v0, %v389_v41  ;;  %v741_v8 = vld [vmem:[#allocation6 + $0x18] sm:$0xff]  ;;  %v828_v41 = vld [vmem:[#allocation8 + $0x20] sm:$0xff] }
 0x1a7   :  { %v598_v30 = vadd.f32 %v597_v20, %v398_v21  ;;  %v642_v42 = vmax.f32 %v606_v24, 0.0  ;;  %v624_v20 = vmax.f32 %v534_v47, 0.0  ;;  %v378_v21 = vld [vmem:[%s1675_s1 + $0x40] sm:$0xff]  ;;  %v623_v24 = vmax.f32 %v529_v61, 0.0 }
 0x1a8   :  { %v1093_v27 = vpop.f32.mrf.mxu0  ;;  %v550_v61 = vadd.f32 %v1551_v63, %v386_v3  ;;  %v748_v63 = vld [vmem:[#allocation6 + $0x50] sm:$0xff] }
 0x1a9   :  { %v609_v31 = vadd.f32 %v1093_v27, %v401_v22  ;;  %v640_v53 = vmax.f32 %v598_v30, 0.0  ;;  %v638_v22 = vmax.f32 %v590_v51, 0.0  ;;  %v654_v25 = vpack.c.bf16 %v625_v15, %v624_v20 }
 0x1aa   :  { %v600_v36 = vpop.f32.mrf.mxu0  ;;  %v518_v30 = vadd.f32 %v1543_v54, %v378_v21  ;;  %v653_v57 = vpack.c.bf16 %v623_v24, %v622_v29  ;;  %v632_v51 = vmax.f32 %v566_v2, 0.0  ;;  %v757_v21 = vpack.c.bf16 %v745_v56, %v744_v7  ;;  %v740_v24 = vld [vmem:[#allocation6 + $0x10] sm:$0xff] }
 0x1ab   :  { %v643_v43 = vmax.f32 %v609_v31, 0.0  ;;  %v601_v44 = vadd.f32 %v600_v36, %v399_v28  ;;  %v661_v27 = vpack.c.bf16 %v639_v17, %v638_v22  ;;  %v637_v28 = vmax.f32 %v585_v18, 0.0  ;;  %v391_v31 = vld [vmem:[%s1675_s1 + $0xa8] sm:$0xff]  ;;  %v750_v18 = vld [vmem:[#allocation6 + $0x60] sm:$0xff] }
 0x1ac   :  { %v569_v36 = vadd.f32 %v1561_v5, %v391_v31  ;;  %v620_v54 = vmax.f32 %v518_v30, 0.0  ;;  %v743_v22 = vld [vmem:[#allocation6 + $0x28] sm:$0xff]  ;;  %v755_v14 = vpack.c.bf16 %v741_v8, %v740_v24 }
 0x1ad   :  { %v641_v58 = vmax.f32 %v601_v44, 0.0  ;;  %v663_v60 = vpack.c.bf16 %v643_v43, %v642_v42  ;;  %v660_v38 = vpack.c.bf16 %v637_v28, %v636_v33  ;;  %v634_v42 = vmax.f32 %v574_v40, 0.0  ;;  %v388_v44 = vld [vmem:[%s1675_s1 + $0x90] sm:$0xff]  ;;  %v836_v28 = vld [vmem:[#allocation8 + $0x60] sm:$0xff]  ;;  %v837_v30 = vld [vmem:[#allocation8 + $0x68] sm:$0xff] }
 0x1ae   :  { %v652_v43 = vpack.c.bf16 %v621_v34, %v620_v54  ;;  %v633_v5 = vmax.f32 %v569_v36, 0.0  ;;  %v558_v49 = vadd.f32 %v1549_v62, %v388_v44  ;;  %v628_v62 = vmax.f32 %v550_v61, 0.0  ;;  %v834_v40 = vld [vmem:[#allocation8 + $0x50] sm:$0xff]  ;;  %v835_v33 = vld [vmem:[#allocation8 + $0x58] sm:$0xff]  ;;  %v832_v34 = vld [vmem:[#allocation8 + $0x40] sm:$0xff] }
 0x1af   :  { %v662_v19 = vpack.c.bf16 %v641_v58, %v640_v53  ;;  %1010 = vmatprep.subr.bf16.mxu1 %v663_v60  ;;  %v659_v47 = vpack.c.bf16 %v635_v35, %v634_v42  ;;  %v631_v53 = vmax.f32 %v561_v46, 0.0  ;;  %v553_v58 = vadd.f32 %v1555_v1, %v387_v48  ;;  %v830_v36 = vld [vmem:[#allocation8 + $0x30] sm:$0xff]  ;;  %v829_v42 = vld [vmem:[#allocation8 + $0x28] sm:$0xff]  ;;  %v827_v44 = vld [vmem:[#allocation8 + $0x18] sm:$0xff] }
 0x1b0   :  { %1011 = vmatpush3.bf16.msra.mxu1 %v655_v16  ;;  %v658_v60 = vpack.c.bf16 %v633_v5, %v632_v51  ;;  %v630_v0 = vmax.f32 %v558_v49, 0.0  ;;  %v752_v16 = vld [vmem:[#allocation6 + $0x70] sm:$0xff]  ;;  %v756_v23 = vpack.c.bf16 %v743_v22, %v742_v13  ;;  %v846_v31 = vpack.c.bf16 %v837_v30, %v836_v28 }
 0x1b1   :  { %1012 = vmatprep.subr.bf16.mxu1 %v662_v19  ;;  %v629_v39 = vmax.f32 %v553_v58, 0.0  ;;  %v761_v1 = vpack.c.bf16 %v753_v59, %v752_v16  ;;  %v751_v19 = vld [vmem:[#allocation6 + $0x68] sm:$0xff]  ;;  %v844_v35 = vpack.c.bf16 %v833_v4, %v832_v34  ;;  %v842_v2 = vpack.c.bf16 %v829_v42, %v828_v41 }
 0x1b2   :  { %v657_v15 = vpack.c.bf16 %v631_v53, %v630_v0 }
 0x1b3   :  { %v656_v17 = vpack.c.bf16 %v629_v39, %v628_v62 }
 0x1b4   :  { %1013 = vmatpush3.bf16.msra.mxu1 %v654_v25  ;;  %v739_v25 = vld [vmem:[#allocation6 + $0x8] sm:$0xff] }
 0x1b5   :  { %1014 = vmatprep.subr.bf16.mxu1 %v661_v27  ;;  %v839_v27 = vld [vmem:[#allocation8 + $0x78] sm:$0xff] }
 0x1b6   :  { %v847_v29 = vpack.c.bf16 %v839_v27, %v838_v26 }
 0x1b8   :  { %1015 = vmatpush3.bf16.msra.mxu1 %v653_v57  ;;  %1114 = vmatprep.subr.bf16.mxu0 %v847_v29  ;;  %v845_v57 = vpack.c.bf16 %v835_v33, %v834_v40 }
 0x1b9   :  { %1016 = vmatprep.subr.bf16.mxu1 %v660_v38  ;;  %1115 = vmatpush3.bf16.msra.mxu0 %v847_v29  ;;  %v831_v38 = vld [vmem:[#allocation8 + $0x38] sm:$0xff] }
 0x1ba   :  { %1116 = vmatprep.subr.bf16.mxu0 %v846_v31  ;;  %v843_v54 = vpack.c.bf16 %v831_v38, %v830_v36 }
 0x1bc   :  { %1017 = vmatpush3.bf16.msra.mxu1 %v652_v43  ;;  %v826_v43 = vld [vmem:[#allocation8 + $0x10] sm:$0xff] }
 0x1bd   :  { %1018 = vmatprep.subr.bf16.mxu1 %v659_v47  ;;  %1117 = vmatpush3.bf16.msra.mxu0 %v846_v31  ;;  %v841_v46 = vpack.c.bf16 %v827_v44, %v826_v43 }
 0x1be   :  { %1118 = vmatprep.subr.bf16.mxu0 %v845_v57 }
 0x1c0   :  { %1019 = vmatpush3.bf16.msra.mxu1 %v1541_v52  ;;  %v760_v52 = vpack.c.bf16 %v751_v19, %v750_v18  ;;  %v824_v18 = vld [vmem:[#allocation8] sm:$0xff]  ;;  %v825_v19 = vld [vmem:[#allocation8 + $0x8] sm:$0xff] }
 0x1c1   :  { %1020 = vmatprep.subr.bf16.mxu1 %v658_v60  ;;  %1119 = vmatpush3.bf16.msra.mxu0 %v845_v57 }
 0x1c2   :  { %1120 = vmatprep.subr.bf16.mxu0 %v844_v35 }
 0x1c4   :  { %1021 = vmatpush3.bf16.msra.mxu1 %v1545_v55  ;;  %v747_v55 = vld [vmem:[#allocation6 + $0x48] sm:$0xff] }
 0x1c5   :  { %1022 = vmatprep.subr.bf16.mxu1 %v657_v15  ;;  %1121 = vmatpush3.bf16.msra.mxu0 %v844_v35 }
 0x1c6   :  { %1122 = vmatprep.subr.bf16.mxu0 %v843_v54 }
 0x1c8   :  { %1023 = vmatpush3.bf16.msra.mxu1 %v1526_v32  ;;  %v759_v32 = vpack.c.bf16 %v749_v6, %v748_v63  ;;  %v990_v63 = vld [vmem:[%s1679_s5] ss:$0 sm:$0xff]  ;;  %s1239_s5 = smov [#allocation9]  }
 0x1c9   :  { %1024 = vmatprep.subr.bf16.mxu1 %v656_v17  ;;  %1123 = vmatpush3.bf16.msra.mxu0 %v843_v54  ;;  %s913_s9 = sshll.u32 %s1239_s5, 4  ;;  %s914_s9 = int_to_ptr.vmem [resolvable:$true] %s913_s9 }
 0x1ca   :  { %1124 = vmatprep.subr.bf16.mxu0 %v842_v2  ;;  %s1205_s12 = scalar_lea.vmem %s914_s9, 512  ;;  %p1210_p2 = scmp.lt.s32.totalorder %s914_s9, %s914_s9 }
 0x1cb   :  { %p1206_p1 = scmp.ne.s32.totalorder %s914_s9, %s1205_s12  ;;  %p1211_p3 = scmp.lt.s32.totalorder %s1205_s12, %s1205_s12 }
 0x1cc   :  { %1025 = vmatpush3.bf16.msra.mxu1 %v1534_v37  ;;  %v746_v37 = vld [vmem:[#allocation6 + $0x40] sm:$0xff] }
 0x1cd   :  { %1094 = vmatprep.subr.bf16.mxu1 %v761_v1  ;;  %v758_v20 = vpack.c.bf16 %v747_v55, %v746_v37  ;;  %1125 = vmatpush3.bf16.msra.mxu0 %v842_v2  ;;  %p1212_p4 = por %p1211_p3, %p1210_p2 }
 0x1ce   :  { %1126 = vmatprep.subr.bf16.mxu0 %v841_v46 }
 0x1cf   :  { %985 = vmatmul.mubr.msk.bf16.vlgmr.msra.gmra.mxu1 %vm1499_vm4, %v1238_v45  ;;  %p1213_p5 = pnand %p1212_p4, %p1206_p1 }
 0x1d0   :  { %987 = vmatprep.mubr.msk.bf16.mxu1 %vm1503_vm12, %v1238_v45  ;;  %1095 = vmatpush3.bf16.msra.mxu1 %v761_v1 }
 0x1d1   :  { %1096 = vmatprep.subr.bf16.mxu1 %v760_v52  ;;  %1127 = vmatpush3.bf16.msra.mxu0 %v841_v46 }
 0x1d4   :  { %1097 = vmatpush3.bf16.msra.mxu1 %v760_v52  ;;  %v840_v52 = vpack.c.bf16 %v825_v19, %v824_v18 }
 0x1d5   :  { %1098 = vmatprep.subr.bf16.mxu1 %v759_v32 }
 0x1d6   :  { %1128 = vmatprep.subr.bf16.mxu0 %v840_v52 }
 0x1d7   :  { %989 = vmatmul.mubr.msk.bf16.gmra.mxu1 %vm1507_vm13, %v1238_v45  ;;  %v738_v45 = vld [vmem:[#allocation6] sm:$0xff]  ;;  %1129 = vmatpush3.bf16.msra.mxu0 %v840_v52 }
 0x1d8   :  { %1099 = vmatpush3.bf16.msra.mxu1 %v759_v32  ;;  %v754_v50 = vpack.c.bf16 %v739_v25, %v738_v45 }
 0x1d9   :  { %1100 = vmatprep.subr.bf16.mxu1 %v758_v20 }
 0x1dc   :  { %1101 = vmatpush3.bf16.msra.mxu1 %v758_v20 }
 0x1dd   :  { %1102 = vmatprep.subr.bf16.mxu1 %v757_v21 }
 0x1e0   :  { %1103 = vmatpush3.bf16.msra.mxu1 %v757_v21 }
 0x1e1   :  { %1104 = vmatprep.subr.bf16.mxu1 %v756_v23 }
 0x1e4   :  { %1105 = vmatpush3.bf16.msra.mxu1 %v756_v23  ;;  %v991_v23 = vld [vmem:[%s1681_s7] ss:$0 sm:$0xff] }
 0x1e5   :  { %1106 = vmatprep.subr.bf16.mxu1 %v755_v14 }
 0x1e8   :  { %1107 = vmatpush3.bf16.msra.mxu1 %v755_v14 }
 0x1e9   :  { %1108 = vmatprep.subr.bf16.mxu1 %v754_v50 }
 0x1ec   :  { %1109 = vmatpush3.bf16.msra.mxu1 %v754_v50 }
 0x28f   :  { %v1026_v47 = vpop.f32.mrf.mxu1 }
 0x291   :  { %v1027_v5 = vpop.f32.mrf.mxu1 }
 0x292   :  { %v1028_v49 = vadd.f32 %v1027_v5, %v1026_v47 }
 0x293   :  { %v1029_v48 = vpop.f32.mrf.mxu1 }
 0x294   :  { %v732_v58 = vadd.f32 %v1028_v49, %v1331_v11 }
 0x295   :  { %v1030_v51 = vpop.f32.mrf.mxu1 }
 0x296   :  { %v1031_v3 = vadd.f32 %v1030_v51, %v1029_v48 }
 0x297   :  { %v1032_v53 = vpop.f32.mrf.mxu1 }
 0x298   :  { %v733_v60 = vadd.f32 %v1031_v3, %v1333_v12 }
 0x299   :  { %v1033_v0 = vpop.f32.mrf.mxu1 }
 0x29a   :  { %v736_v61 = vpack.c.bf16 %v733_v60, %v732_v58  ;;  %v1034_v39 = vadd.f32 %v1033_v0, %v1032_v53 }
 0x29b   :  { %v1035_v15 = vpop.f32.mrf.mxu1 }
 0x29c   :  { %1110 = vmatprep.mubr.bf16.mxu1 %v736_v61  ;;  %v734_v59 = vadd.f32 %v1034_v39, %v1327_v9 }
 0x29d   :  { %v1036_v62 = vpop.f32.mrf.mxu1 }
 0x29e   :  { %v1037_v16 = vadd.f32 %v1036_v62, %v1035_v15 }
 0x2a0   :  { %v735_v17 = vadd.f32 %v1037_v16, %v1329_v10 }
 0x2a2   :  { %v737_v1 = vpack.c.bf16 %v735_v17, %v734_v59 }
 0x2a4   :  { %1111 = vmatmul.mubr.bf16.vlgmr.msra.gmra.mxu1 %v737_v1 }
 0x364   :  { %v1112_v11 = vpop.f32.mrf.mxu1 }
 0x365   :  { %v812_v55 = vadd.f32 %v1112_v11, %v990_v63 }
 0x366   :  { %v803_v12 = vpop.f32.mrf.mxu1 }
 0x367   :  { %v804_v32 = vadd.f32 %v990_v63, %v803_v12  ;;  %v820_v21 = vmax.f32 %v812_v55, 0.0 }
 0x368   :  { %v1113_v6 = vpop.f32.mrf.mxu1 }
 0x369   :  { %v815_v37 = vadd.f32 %v1113_v6, %v990_v63  ;;  %v818_v7 = vmax.f32 %v804_v32, 0.0 }
 0x36a   :  { %v806_v9 = vpop.f32.mrf.mxu1 }
 0x36b   :  { %v807_v20 = vadd.f32 %v990_v63, %v806_v9  ;;  %v821_v10 = vmax.f32 %v815_v37, 0.0 }
 0x36d   :  { %v819_v56 = vmax.f32 %v807_v20, 0.0  ;;  %v823_v22 = vpack.c.bf16 %v821_v10, %v820_v21 }
 0x36f   :  { %v822_v13 = vpack.c.bf16 %v819_v56, %v818_v7 }
 0x371   :  { %1130 = vmatprep.mubr.bf16.mxu0 %v822_v13 }
 0x372   :  { %1131 = vmatmul.mubr.bf16.vlgmr.msra.gmra.mxu0 %v823_v22 }
 0x432   :  { %v1132_v24 = vpop.f32.mrf.mxu0 }
 0x433   :  { %v898_v8 = vadd.f32 %v1132_v24, %v991_v23 }
 0x434   :  { %v889_v14 = vpop.f32.mrf.mxu0 }
 0x435   :  { %906 = vst [vmem:[#allocation9 + $0x10] sm:$0xff] %v898_v8  ;;  %v890_v45 = vadd.f32 %v991_v23, %v889_v14 }
 0x436   :  { %v1133_v25 = vpop.f32.mrf.mxu0 }
 0x437   :  { %904 = vst [vmem:[#allocation9] sm:$0xff] %v890_v45  ;;  %v901_v50 = vadd.f32 %v1133_v25, %v991_v23 }
 0x438   :  { %v892_v26 = vpop.f32.mrf.mxu0 }
 0x439   :  { %907 = vst [vmem:[#allocation9 + $0x18] sm:$0xff] %v901_v50  ;;  %v893_v27 = vadd.f32 %v991_v23, %v892_v26 }
 0x43b   :  { %905 = vst [vmem:[#allocation9 + $0x8] sm:$0xff] %v893_v27 }
 0x43c   :  { %1216 = shalt.err (!%p1213_p5)
}
 0x43d   :  { %919 = dma.vmem_to_hbm [thread:$0]  %s914_s9, 512, %s1682_s8, [#allocation5], %s1233_s10, %s1233_s10, %s1234_s11  }
 0x43e   :  { %1229 = dma.done.wait [#allocation5], 512  }
 0x43f   :  { %1230 = vsyncadd [#allocation5], 4294966784 }
 0x440   :  { %923 = vsyncpa [#allocation4], 1 }
 0x441   :  { %924 = vsyncpa [#allocation7], 1 }
 0x442   :  { %925 = vsyncpa [#allocation5], 1 }

</bundles_post_ra>
